<compile_context>
chip_gen: v6e
topology: v6e:2x2x1
jax: 0.10.0
libtpu: 0.0.40
codegen_flags: <defaults>
</compile_context>

<pallas_src>
import functools

import jax
import jax.numpy as jnp
from jax.experimental import pallas as pl
from jax.experimental.pallas import tpu as pltpu

LANE = 128


# ----------------------------------------------------------------------------
# DCT basis (orthonormal DCT-II, matching torch_dct.dct(..., norm='ortho')).
# ----------------------------------------------------------------------------
def dct_ortho_matrix(N: int) -> jnp.ndarray:
    n = jnp.arange(N, dtype=jnp.float32)
    k = n[:, None]
    D = jnp.cos(jnp.pi * (n[None, :] + 0.5) * k / N) * jnp.sqrt(2.0 / N)
    D = D.at[0].multiply(1.0 / jnp.sqrt(2.0))   # row k=0 scaled -> orthonormal
    return D.astype(jnp.float32)                # idct(ortho) == D.T (orthogonal)


# ----------------------------------------------------------------------------
# Pallas kernels: lane-dense slab   y = D^T @ (exp(-f^2 * sig2) * (D @ x))
# ----------------------------------------------------------------------------
def _freqs_sq_col(L):
    """(L, 1) column of (pi*k/L)^2 — built once per kernel body (cheap VPU)."""
    k = jax.lax.broadcasted_iota(jnp.int32, (L, 1), 0).astype(jnp.float32)
    return (jnp.pi * k / L) ** 2


def _blur_kernel(d_ref, dt_ref, sig2_ref, x_ref, o_ref):
    D = d_ref[...]                               # (L, L), VMEM-resident
    Dt = dt_ref[...]                             # (L, L), VMEM-resident
    x = x_ref[...]                               # (L, tile)
    L = D.shape[0]
    fsq = _freqs_sq_col(L)                       # (L, 1)
    sig2 = sig2_ref[pl.program_id(0)]            # (1, tile), resident (no per-step DMA)
    coefs = jnp.dot(D, x, preferred_element_type=jnp.float32)        # DCT along time
    coefs = coefs * jnp.exp(-fsq * sig2)                             # EUP exp damping
    o_ref[...] = jnp.dot(Dt, coefs,
                         preferred_element_type=jnp.float32).astype(o_ref.dtype)


def _q_xt_kernel(training_noise, d_ref, dt_ref, sig2_ref, x_ref, noise_ref,
                 xt_ref, eps_ref):
    """Fused q_xt_x0: shared forward DCT, two dampings, noise/eps epilogue."""
    D = d_ref[...]
    Dt = dt_ref[...]
    x = x_ref[...]
    L = D.shape[0]
    fsq = _freqs_sq_col(L)                       # (L, 1), once per body
    sig2 = sig2_ref[pl.program_id(0)]            # (2, tile): rows = [t, t-1]
    coefs = jnp.dot(D, x, preferred_element_type=jnp.float32)        # shared DCT
    blur_t = jnp.dot(Dt, coefs * jnp.exp(-fsq * sig2[0:1, :]),
                     preferred_element_type=jnp.float32)
    blur_tm1 = jnp.dot(Dt, coefs * jnp.exp(-fsq * sig2[1:2, :]),
                       preferred_element_type=jnp.float32)
    x_t = blur_t + training_noise * noise_ref[...]                   # fused epilogue
    xt_ref[...] = x_t.astype(xt_ref.dtype)
    eps_ref[...] = (blur_tm1 - x_t).astype(eps_ref.dtype)


# ----------------------------------------------------------------------------
# Layout plumbing: (B, L, C) <-> lane-dense (L, B*C) slab (one pass per boundary).
# ----------------------------------------------------------------------------
def _pad_cols(n):
    return -(-n // LANE) * LANE


def _col_tile(n_pad, max_tile=8192):
    """Largest column tile (multiple of 128) that still gives >= 2 grid steps
    when possible (v7x megacore); otherwise the largest divisor <= max_tile."""
    divisors = [t for t in (8192, 4096, 2048, 1024, 512, 256, 128)
                if t <= max_tile and n_pad % t == 0]
    if not divisors:
        return n_pad
    for t in divisors:
        if n_pad // t >= 2:
            return t
    return divisors[0]


def _to_slab(x):
    B, L, C = x.shape
    n = B * C
    n_pad = _pad_cols(n)
    slab = x.transpose(1, 0, 2).reshape(L, n)    # column j -> (b, c) = (j // C, j % C)
    if n_pad != n:
        slab = jnp.pad(slab, ((0, 0), (0, n_pad - n)))
    return slab


def _from_slab(slab, B, L, C):
    return slab[:, :B * C].reshape(L, B, C).transpose(1, 0, 2)


def _sig2_cols(blur_sigmas, t, C, n_pad):
    """Per-column sigma_t^2 / 2. Padded columns get 0 (scale=1 on zero data)."""
    sig2 = (blur_sigmas[t].astype(jnp.float32) ** 2) * 0.5           # (B,)
    row = jnp.repeat(sig2, C)                                        # (B*C,)
    if n_pad != row.shape[0]:
        row = jnp.pad(row, (0, n_pad - row.shape[0]))
    return row


# ----------------------------------------------------------------------------
# Slab-native ops (use these directly if the surrounding model keeps slab layout).
# ----------------------------------------------------------------------------
def blur_slab(slab, sig2_cols, dct_mat, dct_mat_t):
    """slab: (L, n_pad) f32; sig2_cols: (n_pad,) = sigma_t^2/2 per column."""
    L, n_pad = slab.shape
    tile = _col_tile(n_pad)
    n_tiles = n_pad // tile
    sig2 = sig2_cols.reshape(n_tiles, 1, tile)          # tiny, grid-resident
    return pl.pallas_call(
        _blur_kernel,
        out_shape=jax.ShapeDtypeStruct((L, n_pad), slab.dtype),
        grid=(n_tiles,),
        in_specs=[
            pl.BlockSpec((L, L), lambda j: (0, 0)),                 # D   (resident)
            pl.BlockSpec((L, L), lambda j: (0, 0)),                 # D^T (resident)
            pl.BlockSpec((n_tiles, 1, tile), lambda j: (0, 0, 0)),  # sig2 (resident)
            pl.BlockSpec((L, tile), lambda j: (0, j)),              # x column tile
        ],
        out_specs=pl.BlockSpec((L, tile), lambda j: (0, j)),
        compiler_params=pltpu.CompilerParams(dimension_semantics=("parallel",)),
    )(dct_mat, dct_mat_t, sig2, slab)


def q_xt_x0_slab(slab, noise_slab, sig2_t_cols, sig2_tm1_cols, training_noise,
                 dct_mat, dct_mat_t):
    """Fused blur(t), blur(t-1), noise add and eps, all in slab layout."""
    L, n_pad = slab.shape
    tile = _col_tile(n_pad)
    n_tiles = n_pad // tile
    sig2 = (jnp.stack([sig2_t_cols, sig2_tm1_cols], axis=0)         # (2, n_pad)
            .reshape(2, n_tiles, tile).transpose(1, 0, 2))          # (n_tiles, 2, tile)
    kernel = functools.partial(_q_xt_kernel, float(training_noise))
    return pl.pallas_call(
        kernel,
        out_shape=(jax.ShapeDtypeStruct((L, n_pad), slab.dtype),
                   jax.ShapeDtypeStruct((L, n_pad), slab.dtype)),
        grid=(n_tiles,),
        in_specs=[
            pl.BlockSpec((L, L), lambda j: (0, 0)),                 # D   (resident)
            pl.BlockSpec((L, L), lambda j: (0, 0)),                 # D^T (resident)
            pl.BlockSpec((n_tiles, 2, tile), lambda j: (0, 0, 0)),  # sig2 pair (resident)
            pl.BlockSpec((L, tile), lambda j: (0, j)),              # x column tile
            pl.BlockSpec((L, tile), lambda j: (0, j)),              # noise column tile
        ],
        out_specs=(pl.BlockSpec((L, tile), lambda j: (0, j)),       # x_t
                   pl.BlockSpec((L, tile), lambda j: (0, j))),      # eps
        compiler_params=pltpu.CompilerParams(dimension_semantics=("parallel",)),
    )(dct_mat, dct_mat_t, sig2, slab, noise_slab)


# ----------------------------------------------------------------------------
# Public (B, L, C) ops — one slab conversion per boundary.
# ----------------------------------------------------------------------------
def blur(x, t, blur_sigmas, dct_mat, dct_mat_t):
    """x: (B, L, C) float32; t: (B,) int32."""
    B, L, C = x.shape
    n_pad = _pad_cols(B * C)
    out = blur_slab(_to_slab(x), _sig2_cols(blur_sigmas, t, C, n_pad),
                    dct_mat, dct_mat_t)
    return _from_slab(out, B, L, C)


def q_xt_x0(batch_y, t, key, blur_sigmas, dct_mat, dct_mat_t, training_noise):
    # NOTE: like the PyTorch module this indexes blur_sigmas[t-1]; training t is
    # drawn from [num_steps//4, 3*num_steps//4) so t-1 >= 0.  (For t == 0, JAX
    # gather clamps to index 0 whereas torch would wrap to -1.)
    B, L, C = batch_y.shape
    n_pad = _pad_cols(B * C)
    slab = _to_slab(batch_y)
    # Noise is generated directly in slab layout (same N(0,1) distribution as
    # torch.randn_like) so the fused kernel only touches slab-shaped arrays.
    noise_slab = jax.random.normal(key, (L, n_pad), batch_y.dtype)
    sig2_t = _sig2_cols(blur_sigmas, t, C, n_pad)
    sig2_tm1 = _sig2_cols(blur_sigmas, t - 1, C, n_pad)
    xt_slab, eps_slab = q_xt_x0_slab(slab, noise_slab, sig2_t, sig2_tm1,
                                     training_noise, dct_mat, dct_mat_t)
    return _from_slab(xt_slab, B, L, C), _from_slab(eps_slab, B, L, C)


# ----------------------------------------------------------------------------
# Other module-defined ops (tiny elementwise; plain JAX).
# ----------------------------------------------------------------------------
def get_t(key, batch_size, num_steps, i=None):
    if i is None:
        return jax.random.randint(key, (batch_size,), num_steps // 4,
                                  num_steps * 3 // 4, dtype=jnp.int32)
    return jnp.full((batch_size,), i, dtype=jnp.int32)


def p_xt(xt, eps_hat, t, key, blur_sigmas, sampling_noise):
    noise = jax.random.normal(key, xt.shape, xt.dtype)
    xt = xt + eps_hat
    xt = xt + noise * blur_sigmas[t][:, None, None] * sampling_noise
    return xt


# ----------------------------------------------------------------------------
# Demo / correctness check
# ----------------------------------------------------------------------------
if __name__ == "__main__":
    # configs (small, consistent with the module's __init__)
    pred_len = 16
    d_model = 32
    n_channels = d_model // 8          # 4 feature channels
    num_steps = 8
    batch_size = 2
    training_noise = 0.01
    sampling_noise = 0.01
    blur_sigma_min = 0.5
    blur_sigma_max = 20.0

    # deterministic schedule "parameters", precomputed once (incl. D^T)
    blur_sigmas = jnp.exp(jnp.linspace(jnp.log(blur_sigma_min),
                                       jnp.log(blur_sigma_max),
                                       num_steps)).astype(jnp.float32)
    freqs = jnp.pi * jnp.arange(pred_len, dtype=jnp.float32) / pred_len
    freqs_sq = (freqs ** 2).astype(jnp.float32)     # reference only
    dct_mat = dct_ortho_matrix(pred_len)
    dct_mat_t = dct_mat.T                           # hoisted out of blur()

    key = jax.random.PRNGKey(0)
    k_y, k_t, k_q, k_p = jax.random.split(key, 4)

    batch_y = jax.random.normal(k_y, (batch_size, pred_len, n_channels),
                                dtype=jnp.float32)
    t = get_t(k_t, batch_size, num_steps, i=5)      # (B,) int32, all = 5

    # pure-JAX reference for the blur
    def blur_ref_fn(x, tt):
        sig2 = (blur_sigmas[tt] ** 2) / 2.0
        scale = jnp.exp(-freqs_sq[None, :] * sig2[:, None])          # (B, L)
        coefs = jnp.einsum('kn,bnc->bkc', dct_mat, x) * scale[:, :, None]
        return jnp.einsum('kn,bkc->bnc', dct_mat, coefs)

    # --- standalone Pallas blur kernel ---
    x_blurred = blur(batch_y, t, blur_sigmas, dct_mat, dct_mat_t)
    x_blurred = jax.block_until_ready(x_blurred)
    blur_ref = blur_ref_fn(batch_y, t)
    assert jnp.allclose(x_blurred, blur_ref, atol=1e-4, rtol=1e-4), "blur mismatch"

    # --- fused q_xt_x0 kernel (shared DCT + noise/eps epilogue) ---
    x_t, eps = q_xt_x0(batch_y, t, k_q, blur_sigmas, dct_mat, dct_mat_t,
                       training_noise)
    x_t, eps = jax.block_until_ready((x_t, eps))

    n_pad = _pad_cols(batch_size * n_channels)
    noise_slab = jax.random.normal(k_q, (pred_len, n_pad), jnp.float32)
    noise_bsc = _from_slab(noise_slab, batch_size, pred_len, n_channels)
    x_t_ref = blur_ref_fn(batch_y, t) + training_noise * noise_bsc
    eps_ref = blur_ref_fn(batch_y, t - 1) - x_t_ref
    assert jnp.allclose(x_t, x_t_ref, atol=1e-4, rtol=1e-4), "q_xt_x0 x_t mismatch"
    assert jnp.allclose(eps, eps_ref, atol=1e-4, rtol=1e-4), "q_xt_x0 eps mismatch"

    # --- p_xt (plain JAX elementwise) ---
    x_next = p_xt(x_t, eps, t, k_p, blur_sigmas, sampling_noise)
    x_next = jax.block_until_ready(x_next)
    assert x_t.shape == batch_y.shape and x_next.shape == batch_y.shape

    print("KERNEL_OK")
</pallas_src>

<mosaic_0001>
module attributes {stable_mosaic.version = 11 : i64} {
  func.func @_blur_kernel(%arg0: i32, %arg1: memref<16x16xf32, #tpu.memory_space<vmem>>, %arg2: memref<16x16xf32, #tpu.memory_space<vmem>>, %arg3: memref<1x1x128xf32, #tpu.memory_space<vmem>>, %arg4: memref<16x128xf32, #tpu.memory_space<vmem>>, %arg5: memref<16x128xf32, #tpu.memory_space<vmem>>) attributes {dimension_semantics = [#tpu.dimension_semantics<parallel>], iteration_bounds = array<i64: 1>, scalar_prefetch = 0 : i64, scratch_operands = 0 : i64, tpu.core_type = #tpu.core_type<tc>, window_params = [{pipeline_mode = #tpu.pipeline_mode<synchronous>, transform_indices = @transform_0, window_bounds = array<i64: 16, 16>}, {pipeline_mode = #tpu.pipeline_mode<synchronous>, transform_indices = @transform_1, window_bounds = array<i64: 16, 16>}, {pipeline_mode = #tpu.pipeline_mode<synchronous>, transform_indices = @transform_2, window_bounds = array<i64: 1, 1, 128>}, {transform_indices = @transform_3, window_bounds = array<i64: 16, 128>}, {transform_indices = @transform_4, window_bounds = array<i64: 16, 128>}]} {
    %c0 = arith.constant 0 : index
    %c0_0 = arith.constant 0 : index
    %0 = vector.load %arg1[%c0, %c0_0] : memref<16x16xf32, #tpu.memory_space<vmem>>, vector<16x16xf32>
    %c0_1 = arith.constant 0 : index
    %c0_2 = arith.constant 0 : index
    %1 = vector.load %arg2[%c0_1, %c0_2] : memref<16x16xf32, #tpu.memory_space<vmem>>, vector<16x16xf32>
    %c0_3 = arith.constant 0 : index
    %c0_4 = arith.constant 0 : index
    %2 = vector.load %arg4[%c0_3, %c0_4] : memref<16x128xf32, #tpu.memory_space<vmem>>, vector<16x128xf32>
    %3 = tpu.iota {dimensions = array<i32: 0>} : vector<16x1xi32>
    %4 = arith.sitofp %3 : vector<16x1xi32> to vector<16x1xf32>
    %cst = arith.constant 3.14159274 : f32
    %5 = vector.broadcast %cst : f32 to vector<16x1xf32>
    %6 = arith.mulf %5, %4 : vector<16x1xf32>
    %cst_5 = arith.constant 1.600000e+01 : f32
    %7 = vector.broadcast %cst_5 : f32 to vector<16x1xf32>
    %8 = arith.divf %6, %7 : vector<16x1xf32>
    %9 = arith.mulf %8, %8 : vector<16x1xf32>
    %10 = arith.index_cast %arg0 : i32 to index
    %c0_6 = arith.constant 0 : index
    %c0_7 = arith.constant 0 : index
    %11 = vector.load %arg3[%10, %c0_6, %c0_7] : memref<1x1x128xf32, #tpu.memory_space<vmem>>, vector<1x1x128xf32>
    %12 = vector.shape_cast %11 : vector<1x1x128xf32> to vector<1x128xf32>
    %cst_8 = arith.constant dense<0.000000e+00> : vector<16x128xf32>
    %13 = tpu.matmul %0, %2, %cst_8 {dimension_numbers = #tpu.dot_dimension_numbers<[1], [0], [0], [1], [0, 0, 1, 1], [], []>} : vector<16x16xf32>, vector<16x128xf32>, vector<16x128xf32> -> vector<16x128xf32>
    %cst_9 = arith.constant 0.000000e+00 : f32
    %14 = vector.broadcast %cst_9 : f32 to vector<16x1xf32>
    %15 = arith.subf %14, %9 : vector<16x1xf32>
    %16 = vector.broadcast %15 : vector<16x1xf32> to vector<16x128xf32>
    %17 = vector.broadcast %12 : vector<1x128xf32> to vector<16x128xf32>
    %18 = arith.mulf %16, %17 : vector<16x128xf32>
    %19 = math.exp %18 : vector<16x128xf32>
    %20 = arith.mulf %13, %19 : vector<16x128xf32>
    %cst_10 = arith.constant dense<0.000000e+00> : vector<16x128xf32>
    %21 = tpu.matmul %1, %20, %cst_10 {dimension_numbers = #tpu.dot_dimension_numbers<[1], [0], [0], [1], [0, 0, 1, 1], [], []>} : vector<16x16xf32>, vector<16x128xf32>, vector<16x128xf32> -> vector<16x128xf32>
    %c0_11 = arith.constant 0 : index
    %c0_12 = arith.constant 0 : index
    %22 = vector.load %arg5[%c0_11, %c0_12] : memref<16x128xf32, #tpu.memory_space<vmem>>, vector<16x128xf32>
    tpu.vector_store %arg5[%c0_11, %c0_12], %21 {strides = array<i32>} : memref<16x128xf32, #tpu.memory_space<vmem>>, vector<16x128xf32>,
    return
  }
  func.func @transform_0(%arg0: i32) -> (i32, i32) {
    %c0_i32 = arith.constant 0 : i32
    %c0_i32_0 = arith.constant 0 : i32
    %c0_i32_1 = arith.constant 0 : i32
    return %c0_i32, %c0_i32_0 : i32, i32
  }
  func.func @transform_1(%arg0: i32) -> (i32, i32) {
    %c0_i32 = arith.constant 0 : i32
    %c0_i32_0 = arith.constant 0 : i32
    %c0_i32_1 = arith.constant 0 : i32
    return %c0_i32, %c0_i32_0 : i32, i32
  }
  func.func @transform_2(%arg0: i32) -> (i32, i32, i32) {
    %c0_i32 = arith.constant 0 : i32
    %c0_i32_0 = arith.constant 0 : i32
    %c0_i32_1 = arith.constant 0 : i32
    %c0_i32_2 = arith.constant 0 : i32
    return %c0_i32, %c0_i32_0, %c0_i32_1 : i32, i32, i32
  }
  func.func @transform_3(%arg0: i32) -> (i32, i32) {
    %c0_i32 = arith.constant 0 : i32
    %c0_i32_0 = arith.constant 0 : i32
    return %c0_i32, %arg0 : i32, i32
  }
  func.func @transform_4(%arg0: i32) -> (i32, i32) {
    %c0_i32 = arith.constant 0 : i32
    %c0_i32_0 = arith.constant 0 : i32
    return %c0_i32, %arg0 : i32, i32
  }
}

</mosaic_0001>

<bundles_post_ra>
// kernel: tpu_custom_call.1
= control target key start
LH: loop header
LB: loop body
LE: loop exit
PB: predicated region body
PF: predicated region fallthrough
CT: control target
= control target key end

     0   :  { %9 = vsyncpa [#allocation3], 0  ;;  %s462_s0 = inlined_call_operand.hbm [shape: f32[16,16], index: 0, kind: input, shape index: {}]   ;;  %s463_s1 = inlined_call_operand.hbm [shape: f32[16,16], index: 1, kind: input, shape index: {}]   ;;  %s464_s2 = inlined_call_operand.vmem [shape: f32[1,1,128], index: 2, kind: input, shape index: {}]   ;;  %s465_s3 = inlined_call_operand.hbm [shape: f32[16,128], index: 3, kind: input, shape index: {}]   ;;  %s466_s4 = inlined_call_operand.hbm [shape: f32[16,128], index: 4, kind: output, shape index: {}]  }
   0x1   :  { %10 = vsyncpa [#allocation6], 0 }
   0x2   :  { %11 = vsyncpa [#allocation4], 0  ;;  %s400_s15 = smov [#allocation5]   ;;  %s401_s17 = smov [#allocation2]  }
   0x3   :  { %s29_s16 = sshll.u32 %s400_s15, 4  ;;  %s17_s18 = sshll.u32 %s401_s17, 4  ;;  %s30_s16 = int_to_ptr.vmem [resolvable:$true] %s29_s16  ;;  %s18_s18 = int_to_ptr.vmem [resolvable:$true] %s17_s18 }
   0x4   :  { %s322_s19 = scalar_lea.vmem %s30_s16, 256  ;;  %p327_p1 = scmp.lt.s32.totalorder %s30_s16, %s30_s16 }
   0x5   :  { %p323_p0 = scmp.ne.s32.totalorder %s30_s16, %s322_s19  ;;  %p328_p2 = scmp.lt.s32.totalorder %s322_s19, %s322_s19 }
   0x7   :  { %p329_p3 = por %p328_p2, %p327_p1 }
   0x9   :  { %p330_p4 = pnand %p329_p3, %p323_p0 }
   0xb   :  { %333 = shalt.err (!%p330_p4)
}
   0xc   :  { %s402_s20 = smov 128   ;;  %s403_s21 = smov 8  }
   0xd   :  { %35 = dma.hbm_to_vmem [thread:$0]  %s463_s1, 256, %s30_s16, [#allocation6], %s402_s20, %s402_s20, %s403_s21  }
   0xe   :  { %s342_s24 = scalar_lea.vmem %s18_s18, 256  ;;  %p347_p6 = scmp.lt.s32.totalorder %s18_s18, %s18_s18 }
   0xf   :  { %p343_p5 = scmp.ne.s32.totalorder %s18_s18, %s342_s24  ;;  %p348_p7 = scmp.lt.s32.totalorder %s342_s24, %s342_s24 }
  0x11   :  { %p349_p8 = por %p348_p7, %p347_p6 }
  0x13   :  { %p350_p9 = pnand %p349_p8, %p343_p5 }
  0x15   :  { %353 = shalt.err (!%p350_p9)
}
  0x16   :  { %23 = dma.hbm_to_vmem [thread:$0]  %s462_s0, 256, %s18_s18, [#allocation3], %s402_s20, %s402_s20, %s403_s21  }
  0x17   :  { %s404_s27 = smov [#allocation7]  }
  0x18   :  { %s43_s28 = sshll.u32 %s404_s27, 4  ;;  %s44_s28 = int_to_ptr.vmem [resolvable:$true] %s43_s28 }
  0x19   :  { %s362_s29 = scalar_lea.vmem %s44_s28, 256  ;;  %p367_p11 = scmp.lt.s32.totalorder %s44_s28, %s44_s28 }
  0x1a   :  { %p363_p10 = scmp.ne.s32.totalorder %s44_s28, %s362_s29  ;;  %p368_p12 = scmp.lt.s32.totalorder %s362_s29, %s362_s29 }
  0x1c   :  { %p369_p13 = por %p368_p12, %p367_p11 }
  0x1e   :  { %p370_p0 = pnand %p369_p13, %p363_p10 }
  0x20   :  { %373 = shalt.err (!%p370_p0)
}
  0x21   :  { %49 = dma.hbm_to_vmem [thread:$0]  %s465_s3, 256, %s44_s28, [#allocation6], %s402_s20, %s402_s20, %s403_s21  }
  0x22   :  { %394 = dma.done.wait [#allocation3], 256  }
  0x23   :  { %395 = vsyncadd [#allocation3], 4294967040 }
  0x24   :  { %396 = dma.done.wait [#allocation6], 512  }
  0x25   :  { %397 = vsyncadd [#allocation6], 4294966784  ;;  %vm78_vm0 = vcmask 130048   ;;  %v64_v0 = vld [vmem:[#allocation7 + $0x8] sm:$0xff]  ;;  %v63_v1 = vld [vmem:[#allocation7] sm:$0xff]  ;;  %v65_v5 = vlaneseq }
  0x26   :  { %v59_v2 = vld [vmem:[#allocation2] sm:$0xff]  ;;  %290 = vmatprep.subr.mxu0 %v64_v0  ;;  %v60_v3 = vld [vmem:[#allocation2 + $0x8] sm:$0xff]  ;;  %v61_v4 = vld [vmem:[#allocation5] sm:$0xff] }
  0x27   :  { %294 = vmatprep.mubr.msk.f32.mxu0 %vm78_vm0, %v59_v2  ;;  %291 = vmatpush3.msra.mxu0 %v64_v0  ;;  %v66_v6 = vshrl.u32 %v65_v5, 7  ;;  %v279_v17 = vld [vmem:[%s464_s2] ss:$0 sm:$0xff]  ;;  %v62_v29 = vld [vmem:[#allocation5 + $0x8] sm:$0xff]  ;;  %s405_s2 = smov [#allocation8]  }
  0x28   :  { %292 = vmatprep.subr.mxu0 %v63_v1  ;;  %301 = vmatprep.mubr.msk.f32.mxu1 %vm78_vm0, %v61_v4  ;;  %s264_s5 = sshll.u32 %s405_s2, 4  ;;  %s265_s5 = int_to_ptr.vmem [resolvable:$true] %s264_s5 }
  0x29   :  { %293 = vmatpush3.msra.mxu0 %v63_v1  ;;  %v67_v7 = vadd.s32 8, %v66_v6  ;;  %v68_v9 = vcvt.s32.f32 %v66_v6  ;;  %s374_s6 = scalar_lea.vmem %s265_s5, 256  ;;  %p379_p2 = scmp.lt.s32.totalorder %s265_s5, %s265_s5 }
  0x2a   :  { %295 = vmatmul.mubr.msk.f32.vlgmr.msra.gmra.mxu0 %vm78_vm0, %v60_v3  ;;  %p375_p1 = scmp.ne.s32.totalorder %s265_s5, %s374_s6  ;;  %p380_p3 = scmp.lt.s32.totalorder %s374_s6, %s374_s6 }
  0x2b   :  { %v69_v8 = vcvt.s32.f32 %v67_v7  ;;  %v70_v11 = vmul.f32 3.1415927, %v68_v9 }
  0x2c   :  { %p381_p4 = por %p380_p3, %p379_p2 }
  0x2d   :  { %v71_v10 = vmul.f32 3.1415927, %v69_v8  ;;  %v73_v13 = vmul.f32 0.0625, %v70_v11 }
  0x2e   :  { %p382_p5 = pnand %p381_p4, %p375_p1 }
  0x2f   :  { %v74_v12 = vmul.f32 0.0625, %v71_v10  ;;  %v75_v15 = vmul.f32 %v73_v13, %v73_v13 }
  0x31   :  { %v76_v14 = vmul.f32 %v74_v12, %v74_v12  ;;  %v160_v18 = vsub.f32 0.0, %v75_v15 }
  0x33   :  { %v161_v16 = vsub.f32 0.0, %v76_v14  ;;  %v168_v20 = vmul.f32 %v279_v17, %v160_v18 }
  0x35   :  { %v169_v19 = vmul.f32 %v279_v17, %v161_v16  ;;  %v170_v22 = vmul.f32 1.442695, %v168_v20 }
  0x37   :  { %v172_v21 = vmul.f32 1.442695, %v169_v19 }
  0x39   :  { %310 = vpow2.f32 %v172_v21 }
  0x3a   :  { %312 = vpow2.f32 %v170_v22 }
  0x46   :  { %v311_v23 = vpop.eup %310 }
  0x47   :  { %v313_v24 = vpop.eup %312 }
  0xea   :  { %v296_v25 = vpop.f32.mrf.mxu0 }
  0xeb   :  { %v175_v26 = vmul.f32 %v311_v23, %v296_v25 }
  0xec   :  { %v151_v27 = vpop.f32.mrf.mxu0 }
  0xed   :  { %v174_v28 = vmul.f32 %v313_v24, %v151_v27  ;;  %297 = vmatprep.subr.mxu1 %v175_v26 }
  0xee   :  { %298 = vmatpush3.msra.mxu1 %v175_v26 }
  0xef   :  { %299 = vmatprep.subr.mxu1 %v174_v28 }
  0xf0   :  { %300 = vmatpush3.msra.mxu1 %v174_v28 }
  0xf1   :  { %302 = vmatmul.mubr.msk.f32.vlgmr.msra.gmra.mxu1 %vm78_vm0, %v62_v29 }
 0x1b1   :  { %v303_v30 = vpop.f32.mrf.mxu1 }
 0x1b2   :  { %258 = vst [vmem:[#allocation8 + $0x8] sm:$0xff] %v303_v30 }
 0x1b3   :  { %v248_v31 = vpop.f32.mrf.mxu1 }
 0x1b4   :  { %257 = vst [vmem:[#allocation8] sm:$0xff] %v248_v31 }
 0x1b5   :  { %385 = shalt.err (!%p382_p5)
}
 0x1b6   :  { %270 = dma.vmem_to_hbm [thread:$0]  %s265_s5, 256, %s466_s4, [#allocation4], %s402_s20, %s402_s20, %s403_s21  }
 0x1b7   :  { %398 = dma.done.wait [#allocation4], 256  }
 0x1b8   :  { %399 = vsyncadd [#allocation4], 4294967040 }
 0x1b9   :  { %274 = vsyncpa [#allocation3], 1 }
 0x1ba   :  { %275 = vsyncpa [#allocation6], 1 }
 0x1bb   :  { %276 = vsyncpa [#allocation4], 1 }

</bundles_post_ra>
